<compile_context>
chip_gen: v7x
topology: tpu7x:2x2x1
jax: 0.10.0
libtpu: 0.0.40
codegen_flags: <defaults>
</compile_context>

<pallas_src>
import functools

import jax
import jax.numpy as jnp
from jax import lax
from jax.experimental import pallas as pl
from jax.experimental.pallas import tpu as pltpu


def _grouped_linear_sin_kernel(x_ref, w_ref, b_ref, o_ref, *, precision):
    # x_ref: (bb, 500)  w_ref: (500, 250)  b_ref: (1, 250)  o_ref: (bb, 250)
    y = jnp.dot(
        x_ref[...],
        w_ref[...],
        preferred_element_type=jnp.float32,
        precision=precision,
    )
    o_ref[...] = jnp.sin(y + b_ref[...])


def _round_up(v, m):
    return (v + m - 1) // m * m


def _pick_batch_block(batch, block_b):
    """Batch tile: multiple of 8 (or full dim); >=2 blocks when batch > 256."""
    block_b = max(8, (block_b // 8) * 8)      # defensive (8,128) compliance
    if batch <= min(block_b, 256):
        return batch                          # single full-dim block (always legal)
    if batch <= 256:
        return block_b
    # Guarantee at least two grid blocks so v7x's second TensorCore gets work.
    return min(block_b, _round_up((batch + 1) // 2, 8))


def build_group_params(weights, biases=None):
    """weights: (G, out_f, in_f); biases: (G, out_f) or None.

    Returns (wbd, bcat): block-diagonal W^T of shape (G*in_f, G*out_f) and the
    concatenated bias (1, G*out_f).  Call ONCE and reuse (hoisted out of the
    per-forward path).
    """
    weights = jnp.asarray(weights, jnp.float32)
    n_groups, out_f, in_f = weights.shape
    wbd = jnp.zeros((n_groups * in_f, n_groups * out_f), jnp.float32)
    for i in range(n_groups):
        wbd = wbd.at[i * in_f:(i + 1) * in_f, i * out_f:(i + 1) * out_f].set(
            weights[i].T)
    if biases is None:
        bcat = jnp.zeros((1, n_groups * out_f), jnp.float32)
    else:
        bcat = jnp.asarray(biases, jnp.float32).reshape(1, n_groups * out_f)
    return wbd, bcat


def grouped_linear_sin(x, wbd, bcat, *, block_b=2048,
                       precision=lax.Precision.DEFAULT):
    """sin(x @ wbd + bcat) with a batch-tiled Pallas kernel. x: (B, 500) f32."""
    B, in_total = x.shape
    k_in, out_total = wbd.shape
    assert in_total == k_in, (in_total, k_in)

    bb = _pick_batch_block(B, block_b)
    n_blocks = pl.cdiv(B, bb)

    # Double-buffered x/out tiles + double-buffered resident weight + slack.
    vmem_need = (2 * bb * (in_total + out_total)
                 + 2 * in_total * out_total
                 + 2 * out_total) * 4
    vmem_limit = int(min(max(vmem_need + (4 << 20), 32 << 20), 64 << 20))

    kernel = functools.partial(_grouped_linear_sin_kernel, precision=precision)

    cost = pl.CostEstimate(
        flops=2 * B * in_total * out_total,
        transcendentals=B * out_total,
        bytes_accessed=(B * (in_total + out_total)
                        + in_total * out_total + out_total) * 4,
    )

    return pl.pallas_call(
        kernel,
        out_shape=jax.ShapeDtypeStruct((B, out_total), jnp.float32),
        grid=(n_blocks,),
        in_specs=[
            pl.BlockSpec((bb, in_total), lambda i: (i, 0)),          # x: batch-tiled
            pl.BlockSpec((in_total, out_total), lambda i: (0, 0)),   # weight: resident
            pl.BlockSpec((1, out_total), lambda i: (0, 0)),          # bias: resident
        ],
        out_specs=pl.BlockSpec((bb, out_total), lambda i: (i, 0)),
        compiler_params=pltpu.CompilerParams(
            dimension_semantics=("parallel",),
            vmem_limit_bytes=vmem_limit,
        ),
        cost_estimate=cost,
    )(x, wbd, bcat)


def make_my_module5(weights, biases=None, *, block_b=2048,
                    precision=lax.Precision.DEFAULT):
    """Factory mirroring MyModule5: builds the block-diag weight once, returns
    a jitted forward(x)."""
    wbd, bcat = build_group_params(weights, biases)

    @jax.jit
    def forward(x):
        return grouped_linear_sin(x, wbd, bcat, block_b=block_b,
                                  precision=precision)

    return forward


def _reference(x, weights, biases, precision=lax.Precision.DEFAULT):
    """Pure-JAX reference mirroring the PyTorch forward."""
    n_groups = weights.shape[0]
    chunks = jnp.split(x, n_groups, axis=1)
    outs = []
    for i, c in enumerate(chunks):
        y = jnp.dot(c, weights[i].T, precision=precision)
        if biases is not None:
            y = y + biases[i]
        outs.append(y)
    return jnp.sin(jnp.concatenate(outs, axis=1))


def _bf16_exact(a):
    # Quantize test data to bf16-representable f32 so the (explicit, DEFAULT
    # precision) single-pass bf16 matmul has zero input-rounding error and the
    # kernel matches the f32 reference to summation-order noise.
    return a.astype(jnp.bfloat16).astype(jnp.float32)


if __name__ == "__main__":
    key = jax.random.PRNGKey(0)
    kw, kb, kx1, kx2 = jax.random.split(key, 4)

    # ParameterList of 5 weights (50, 100) and 5 biases (50,), stacked.
    weights = _bf16_exact(jax.random.normal(kw, (5, 50, 100), dtype=jnp.float32))
    biases = _bf16_exact(jax.random.normal(kb, (5, 50), dtype=jnp.float32))

    forward = make_my_module5(weights, biases)   # block-diag weight built once

    # Small batch: single full-dim block.
    B1 = 8
    x1 = _bf16_exact(jax.random.normal(kx1, (B1, 500), dtype=jnp.float32))
    o1 = jax.block_until_ready(forward(x1))
    r1 = _reference(x1, weights, biases)
    assert o1.shape == (B1, 250), o1.shape
    assert jnp.allclose(o1, r1, atol=1e-3, rtol=1e-3), float(
        jnp.max(jnp.abs(o1 - r1)))

    # Medium batch, no padding: B=300 -> bb=152, grid=2 (v7x two-block split),
    # ragged tail handled by masked writeback (rows 300..303 discarded).
    B2 = 300
    x2 = _bf16_exact(jax.random.normal(kx2, (B2, 500), dtype=jnp.float32))
    o2 = jax.block_until_ready(forward(x2))
    r2 = _reference(x2, weights, biases)
    assert o2.shape == (B2, 250), o2.shape
    assert jnp.allclose(o2, r2, atol=1e-3, rtol=1e-3), float(
        jnp.max(jnp.abs(o2 - r2)))
    assert bool(jnp.all(jnp.isfinite(o2)))

    # Caller-supplied small tile (multiple-of-8 rounding + 3-block ragged grid).
    wbd, bcat = build_group_params(weights, biases)
    o3 = jax.block_until_ready(
        grouped_linear_sin(x2, wbd, bcat, block_b=100))   # rounds down to 96
    assert o3.shape == (B2, 250), o3.shape
    assert jnp.allclose(o3, r2, atol=1e-3, rtol=1e-3), float(
        jnp.max(jnp.abs(o3 - r2)))

    print("KERNEL_OK")
</pallas_src>

<mosaic_0001>
module attributes {stable_mosaic.version = 11 : i64} {
  func.func @_grouped_linear_sin_kernel(%arg0: i32, %arg1: memref<8x500xf32, #tpu.memory_space<vmem>>, %arg2: memref<500x250xf32, #tpu.memory_space<vmem>>, %arg3: memref<1x250xf32, #tpu.memory_space<vmem>>, %arg4: memref<8x250xf32, #tpu.memory_space<vmem>>) attributes {dimension_semantics = [#tpu.dimension_semantics<parallel>], iteration_bounds = array<i64: 1>, scalar_prefetch = 0 : i64, scratch_operands = 0 : i64, tpu.core_type = #tpu.core_type<tc>, window_params = [{transform_indices = @transform_0, window_bounds = array<i64: 8, 500>}, {pipeline_mode = #tpu.pipeline_mode<synchronous>, transform_indices = @transform_1, window_bounds = array<i64: 500, 250>}, {pipeline_mode = #tpu.pipeline_mode<synchronous>, transform_indices = @transform_2, window_bounds = array<i64: 1, 250>}, {transform_indices = @transform_3, window_bounds = array<i64: 8, 250>}]} {
    %c0 = arith.constant 0 : index
    %c0_0 = arith.constant 0 : index
    %0 = vector.load %arg1[%c0, %c0_0] : memref<8x500xf32, #tpu.memory_space<vmem>>, vector<8x500xf32>
    %c0_1 = arith.constant 0 : index
    %c0_2 = arith.constant 0 : index
    %1 = vector.load %arg2[%c0_1, %c0_2] : memref<500x250xf32, #tpu.memory_space<vmem>>, vector<500x250xf32>
    %cst = arith.constant dense<0.000000e+00> : vector<8x250xf32>
    %2 = tpu.matmul %0, %1, %cst {dimension_numbers = #tpu.dot_dimension_numbers<[1], [0], [0], [1], [0, 0, 1, 1], [], []>} : vector<8x500xf32>, vector<500x250xf32>, vector<8x250xf32> -> vector<8x250xf32>
    %c0_3 = arith.constant 0 : index
    %c0_4 = arith.constant 0 : index
    %3 = vector.load %arg3[%c0_3, %c0_4] : memref<1x250xf32, #tpu.memory_space<vmem>>, vector<1x250xf32>
    %4 = vector.broadcast %3 : vector<1x250xf32> to vector<8x250xf32>
    %5 = arith.addf %2, %4 : vector<8x250xf32>
    %6 = math.sin %5 : vector<8x250xf32>
    %c0_5 = arith.constant 0 : index
    %c0_6 = arith.constant 0 : index
    %7 = vector.load %arg4[%c0_5, %c0_6] : memref<8x250xf32, #tpu.memory_space<vmem>>, vector<8x250xf32>
    tpu.vector_store %arg4[%c0_5, %c0_6], %6 {strides = array<i32>} : memref<8x250xf32, #tpu.memory_space<vmem>>, vector<8x250xf32>,
    return
  }
  func.func @transform_0(%arg0: i32) -> (i32, i32) {
    %c0_i32 = arith.constant 0 : i32
    %c0_i32_0 = arith.constant 0 : i32
    return %arg0, %c0_i32 : i32, i32
  }
  func.func @transform_1(%arg0: i32) -> (i32, i32) {
    %c0_i32 = arith.constant 0 : i32
    %c0_i32_0 = arith.constant 0 : i32
    %c0_i32_1 = arith.constant 0 : i32
    return %c0_i32, %c0_i32_0 : i32, i32
  }
  func.func @transform_2(%arg0: i32) -> (i32, i32) {
    %c0_i32 = arith.constant 0 : i32
    %c0_i32_0 = arith.constant 0 : i32
    %c0_i32_1 = arith.constant 0 : i32
    return %c0_i32, %c0_i32_0 : i32, i32
  }
  func.func @transform_3(%arg0: i32) -> (i32, i32) {
    %c0_i32 = arith.constant 0 : i32
    %c0_i32_0 = arith.constant 0 : i32
    return %arg0, %c0_i32 : i32, i32
  }
}

</mosaic_0001>

<bundles_post_ra>
// kernel: forward.1
= control target key start
LH: loop header
LB: loop body
LE: loop exit
PB: predicated region body
PF: predicated region fallthrough
CT: control target
= control target key end

     0   :  { %8 = vsyncpa [#allocation3], 0  ;;  %s941_s0 = inlined_call_operand.hbm [shape: f32[8,500], index: 0, kind: input, shape index: {}]   ;;  %s942_s1 = inlined_call_operand.hbm [shape: f32[500,250], index: 1, kind: input, shape index: {}]   ;;  %s943_s2 = inlined_call_operand.vmem [shape: f32[1,250], index: 2, kind: input, shape index: {}]   ;;  %s944_s3 = inlined_call_operand.hbm [shape: f32[8,250], index: 3, kind: output, shape index: {}]  }
   0x1   :  { %9 = vsyncpa [#allocation6], 0 }
   0x2   :  { %10 = vsyncpa [#allocation4], 0  ;;  %s801_s12 = smov [#allocation2]   ;;  %s802_s14 = smov [#allocation5]  }
   0x3   :  { %s17_s13 = sshll.u32 %s801_s12, 4  ;;  %s26_s15 = sshll.u32 %s802_s14, 4  ;;  %s18_s13 = int_to_ptr.vmem [resolvable:$true] %s17_s13  ;;  %s832_s15 = int_to_ptr.vmem [resolvable:$true] %s26_s15 }
   0x4   :  { %s729_s18 = scalar_lea.hbm %s941_s0, 512 }
   0x5   :  { %p730_p0 = scmp.ne.s32.totalorder %s941_s0, %s729_s18  ;;  %p733_p1 = scmp.lt.u32.totalorder %s729_s18, %s941_s0 }
   0x7   :  { %p735_p2 = pnand %p733_p1, %p730_p0 }
   0x9   :  { %738 = shalt.err (!%p735_p2)
}
   0xa   :  { %s739_s23 = scalar_lea.vmem %s18_s13, 512  ;;  %p744_p4 = scmp.lt.s32.totalorder %s18_s13, %s18_s13 }
   0xb   :  { %p740_p3 = scmp.ne.s32.totalorder %s18_s13, %s739_s23  ;;  %p745_p5 = scmp.lt.s32.totalorder %s739_s23, %s739_s23 }
   0xd   :  { %p746_p6 = por %p745_p5, %p744_p4 }
   0xf   :  { %p747_p7 = pnand %p746_p6, %p740_p3 }
  0x11   :  { %750 = shalt.err (!%p747_p7)
}
  0x12   :  { %20 = dma.hbm_to_vmem [thread:$0]  %s941_s0, 512, %s18_s13, [#allocation3]  }
  0x13   :  { %s751_s28 = scalar_lea.hbm %s942_s1, 16128 }
  0x14   :  { %p752_p8 = scmp.ne.s32.totalorder %s942_s1, %s751_s28  ;;  %p755_p9 = scmp.lt.u32.totalorder %s751_s28, %s942_s1 }
  0x16   :  { %p757_p10 = pnand %p755_p9, %p752_p8 }
  0x18   :  { %760 = shalt.err (!%p757_p10)
}
  0x19   :  { %s761_s6 = scalar_lea.vmem %s832_s15, 16128  ;;  %p766_p12 = scmp.lt.s32.totalorder %s832_s15, %s832_s15 }
  0x1a   :  { %p762_p11 = scmp.ne.s32.totalorder %s832_s15, %s761_s6  ;;  %p767_p13 = scmp.lt.s32.totalorder %s761_s6, %s761_s6 }
  0x1c   :  { %p768_p0 = por %p767_p13, %p766_p12 }
  0x1e   :  { %p769_p1 = pnand %p768_p0, %p762_p11 }
  0x20   :  { %772 = shalt.err (!%p769_p1)
}
  0x21   :  { %s803_s0 = smov 256   ;;  %s804_s7 = smov 16  }
  0x22   :  { %32 = dma.hbm_to_vmem [thread:$0]  %s942_s1, 16128, %s832_s15, [#allocation6], %s803_s0, %s803_s0, %s804_s7  }
  0x23   :  { %795 = dma.done.wait [#allocation3], 512  }
  0x24   :  { %796 = vsyncadd [#allocation3], 4294966784 }
  0x25   :  { %797 = dma.done.wait [#allocation6], 16128  }
  0x26   :  { %798 = vsyncadd [#allocation6], 4294951168  ;;  %v46_v0 = vld [vmem:[#allocation5 + $0x8] sm:$0xff]  ;;  %v48_v1 = vld [vmem:[#allocation5 + $0x18] sm:$0xff]  ;;  %vm183_vm0 = vcmask 949248   ;;  %vm187_vm1 = vcmask 1043456  }
  0x27   :  { %v45_v2 = vld [vmem:[#allocation5] sm:$0xff]  ;;  %v574_v3 = vpack.c.bf16 %v48_v1, %v46_v0  ;;  %v47_v4 = vld [vmem:[#allocation5 + $0x10] sm:$0xff]  ;;  %v110_v5 = vld [vmem:[#allocation5 + $0x208] sm:$0xff] }
  0x28   :  { %v112_v6 = vld [vmem:[#allocation5 + $0x218] sm:$0xff]  ;;  %v576_v7 = vpack.c.bf16 %v47_v4, %v45_v2  ;;  %v50_v9 = vld [vmem:[#allocation5 + $0x28] sm:$0xff]  ;;  %v109_v11 = vld [vmem:[#allocation5 + $0x200] sm:$0xff] }
  0x29   :  { %v638_v8 = vpack.c.bf16 %v112_v6, %v110_v5  ;;  %v52_v10 = vld [vmem:[#allocation5 + $0x38] sm:$0xff]  ;;  %575 = vmatprep.subr.bf16.mxu1 %v574_v3  ;;  %v111_v13 = vld [vmem:[#allocation5 + $0x210] sm:$0xff]  ;;  %v49_v14 = vld [vmem:[#allocation5 + $0x20] sm:$0xff] }
  0x2a   :  { %v578_v12 = vpack.c.bf16 %v52_v10, %v50_v9  ;;  %v51_v15 = vld [vmem:[#allocation5 + $0x30] sm:$0xff]  ;;  %577 = vmatpush1.bf16.msra.mxu1 %v576_v7  ;;  %v640_v16 = vpack.c.bf16 %v111_v13, %v109_v11  ;;  %v114_v18 = vld [vmem:[#allocation5 + $0x228] sm:$0xff]  ;;  %v116_v19 = vld [vmem:[#allocation5 + $0x238] sm:$0xff] }
  0x2b   :  { %639 = vmatprep.subr.bf16.mxu0 %v638_v8  ;;  %v580_v17 = vpack.c.bf16 %v51_v15, %v49_v14  ;;  %v54_v20 = vld [vmem:[#allocation5 + $0x48] sm:$0xff]  ;;  %v642_v21 = vpack.c.bf16 %v116_v19, %v114_v18  ;;  %v56_v22 = vld [vmem:[#allocation5 + $0x58] sm:$0xff]  ;;  %v113_v23 = vld [vmem:[#allocation5 + $0x220] sm:$0xff] }
  0x2c   :  { %579 = vmatprep.subr.bf16.mxu1 %v578_v12  ;;  %v115_v24 = vld [vmem:[#allocation5 + $0x230] sm:$0xff]  ;;  %641 = vmatpush1.bf16.msra.mxu0 %v640_v16  ;;  %v582_v25 = vpack.c.bf16 %v56_v22, %v54_v20  ;;  %v53_v27 = vld [vmem:[#allocation5 + $0x40] sm:$0xff]  ;;  %v118_v29 = vld [vmem:[#allocation5 + $0x248] sm:$0xff] }
  0x2d   :  { %v644_v26 = vpack.c.bf16 %v115_v24, %v113_v23  ;;  %v55_v28 = vld [vmem:[#allocation5 + $0x50] sm:$0xff]  ;;  %643 = vmatprep.subr.bf16.mxu0 %v642_v21  ;;  %v120_v30 = vld [vmem:[#allocation5 + $0x258] sm:$0xff]  ;;  %v58_v31 = vld [vmem:[#allocation5 + $0x68] sm:$0xff] }
  0x2e   :  { %v60_v32 = vld [vmem:[#allocation5 + $0x78] sm:$0xff]  ;;  %581 = vmatpush1.bf16.msra.mxu1 %v580_v17  ;;  %v584_v33 = vpack.c.bf16 %v55_v28, %v53_v27  ;;  %v646_v34 = vpack.c.bf16 %v120_v30, %v118_v29  ;;  %v117_v35 = vld [vmem:[#allocation5 + $0x240] sm:$0xff]  ;;  %v119_v36 = vld [vmem:[#allocation5 + $0x250] sm:$0xff] }
  0x2f   :  { %v57_v37 = vld [vmem:[#allocation5 + $0x60] sm:$0xff]  ;;  %583 = vmatprep.subr.bf16.mxu1 %v582_v25  ;;  %v586_v38 = vpack.c.bf16 %v60_v32, %v58_v31  ;;  %v59_v39 = vld [vmem:[#allocation5 + $0x70] sm:$0xff]  ;;  %v122_v40 = vld [vmem:[#allocation5 + $0x268] sm:$0xff]  ;;  %v648_v42 = vpack.c.bf16 %v119_v36, %v117_v35 }
  0x30   :  { %v124_v41 = vld [vmem:[#allocation5 + $0x278] sm:$0xff]  ;;  %645 = vmatpush1.bf16.msra.mxu0 %v644_v26  ;;  %v62_v43 = vld [vmem:[#allocation5 + $0x88] sm:$0xff]  ;;  %v121_v46 = vld [vmem:[#allocation5 + $0x260] sm:$0xff]  ;;  %v588_v48 = vpack.c.bf16 %v59_v39, %v57_v37 }
  0x31   :  { %v64_v44 = vld [vmem:[#allocation5 + $0x98] sm:$0xff]  ;;  %647 = vmatprep.subr.bf16.mxu0 %v646_v34  ;;  %v650_v45 = vpack.c.bf16 %v124_v41, %v122_v40  ;;  %v123_v47 = vld [vmem:[#allocation5 + $0x270] sm:$0xff]  ;;  %v126_v49 = vld [vmem:[#allocation5 + $0x288] sm:$0xff] }
  0x32   :  { %585 = vmatpush1.bf16.msra.mxu1 %v584_v33  ;;  %v128_v50 = vld [vmem:[#allocation5 + $0x298] sm:$0xff]  ;;  %v590_v51 = vpack.c.bf16 %v64_v44, %v62_v43  ;;  %v61_v52 = vld [vmem:[#allocation5 + $0x80] sm:$0xff]  ;;  %v63_v53 = vld [vmem:[#allocation5 + $0x90] sm:$0xff]  ;;  %v652_v54 = vpack.c.bf16 %v123_v47, %v121_v46 }
  0x33   :  { %587 = vmatprep.subr.bf16.mxu1 %v586_v38  ;;  %v66_v55 = vld [vmem:[#allocation5 + $0xa8] sm:$0xff]  ;;  %v68_v56 = vld [vmem:[#allocation5 + $0xb8] sm:$0xff]  ;;  %v654_v57 = vpack.c.bf16 %v128_v50, %v126_v49  ;;  %v125_v58 = vld [vmem:[#allocation5 + $0x280] sm:$0xff]  ;;  %v592_v60 = vpack.c.bf16 %v63_v53, %v61_v52 }
  0x34   :  { %649 = vmatpush1.bf16.msra.mxu0 %v648_v42  ;;  %v127_v59 = vld [vmem:[#allocation5 + $0x290] sm:$0xff]  ;;  %v130_v61 = vld [vmem:[#allocation5 + $0x2a8] sm:$0xff]  ;;  %v132_v62 = vld [vmem:[#allocation5 + $0x2b8] sm:$0xff]  ;;  %v594_v63 = vpack.c.bf16 %v68_v56, %v66_v55 }
  0x35   :  { %651 = vmatprep.subr.bf16.mxu0 %v650_v45  ;;  %v65_v0 = vld [vmem:[#allocation5 + $0xa0] sm:$0xff]  ;;  %v67_v1 = vld [vmem:[#allocation5 + $0xb0] sm:$0xff]  ;;  %v656_v2 = vpack.c.bf16 %v127_v59, %v125_v58  ;;  %v70_v3 = vld [vmem:[#allocation5 + $0xc8] sm:$0xff]  ;;  %v658_v5 = vpack.c.bf16 %v132_v62, %v130_v61 }
  0x36   :  { %589 = vmatpush1.bf16.msra.mxu1 %v588_v48  ;;  %v72_v4 = vld [vmem:[#allocation5 + $0xd8] sm:$0xff]  ;;  %v129_v6 = vld [vmem:[#allocation5 + $0x2a0] sm:$0xff]  ;;  %v131_v7 = vld [vmem:[#allocation5 + $0x2b0] sm:$0xff]  ;;  %v596_v8 = vpack.c.bf16 %v67_v1, %v65_v0 }
  0x37   :  { %591 = vmatprep.subr.bf16.mxu1 %v590_v51  ;;  %v134_v9 = vld [vmem:[#allocation5 + $0x2c8] sm:$0xff]  ;;  %v136_v10 = vld [vmem:[#allocation5 + $0x2d8] sm:$0xff]  ;;  %v598_v11 = vpack.c.bf16 %v72_v4, %v70_v3  ;;  %v69_v12 = vld [vmem:[#allocation5 + $0xc0] sm:$0xff]  ;;  %v660_v14 = vpack.c.bf16 %v131_v7, %v129_v6 }
  0x38   :  { %653 = vmatpush1.bf16.msra.mxu0 %v652_v54  ;;  %v71_v13 = vld [vmem:[#allocation5 + $0xd0] sm:$0xff]  ;;  %v74_v15 = vld [vmem:[#allocation5 + $0xe8] sm:$0xff]  ;;  %v76_v16 = vld [vmem:[#allocation5 + $0xf8] sm:$0xff]  ;;  %v662_v17 = vpack.c.bf16 %v136_v10, %v134_v9 }
  0x39   :  { %655 = vmatprep.subr.bf16.mxu0 %v654_v57  ;;  %v133_v18 = vld [vmem:[#allocation5 + $0x2c0] sm:$0xff]  ;;  %v135_v19 = vld [vmem:[#allocation5 + $0x2d0] sm:$0xff]  ;;  %v600_v20 = vpack.c.bf16 %v71_v13, %v69_v12  ;;  %v138_v21 = vld [vmem:[#allocation5 + $0x2e8] sm:$0xff]  ;;  %v602_v23 = vpack.c.bf16 %v76_v16, %v74_v15 }
  0x3a   :  { %593 = vmatpush1.bf16.msra.mxu1 %v592_v60  ;;  %v140_v22 = vld [vmem:[#allocation5 + $0x2f8] sm:$0xff]  ;;  %v73_v24 = vld [vmem:[#allocation5 + $0xe0] sm:$0xff]  ;;  %v75_v25 = vld [vmem:[#allocation5 + $0xf0] sm:$0xff]  ;;  %v664_v26 = vpack.c.bf16 %v135_v19, %v133_v18 }
  0x3b   :  { %595 = vmatprep.subr.bf16.mxu1 %v594_v63  ;;  %v78_v27 = vld [vmem:[#allocation5 + $0x108] sm:$0xff]  ;;  %v80_v28 = vld [vmem:[#allocation5 + $0x118] sm:$0xff]  ;;  %v666_v29 = vpack.c.bf16 %v140_v22, %v138_v21  ;;  %v137_v30 = vld [vmem:[#allocation5 + $0x2e0] sm:$0xff]  ;;  %v604_v32 = vpack.c.bf16 %v75_v25, %v73_v24 }
  0x3c   :  { %657 = vmatpush1.bf16.msra.mxu0 %v656_v2  ;;  %v139_v31 = vld [vmem:[#allocation5 + $0x2f0] sm:$0xff]  ;;  %v142_v33 = vld [vmem:[#allocation5 + $0x308] sm:$0xff]  ;;  %v144_v34 = vld [vmem:[#allocation5 + $0x318] sm:$0xff]  ;;  %v606_v35 = vpack.c.bf16 %v80_v28, %v78_v27 }
  0x3d   :  { %659 = vmatprep.subr.bf16.mxu0 %v658_v5  ;;  %v77_v36 = vld [vmem:[#allocation5 + $0x100] sm:$0xff]  ;;  %v79_v37 = vld [vmem:[#allocation5 + $0x110] sm:$0xff]  ;;  %v668_v38 = vpack.c.bf16 %v139_v31, %v137_v30  ;;  %v82_v39 = vld [vmem:[#allocation5 + $0x128] sm:$0xff]  ;;  %v670_v41 = vpack.c.bf16 %v144_v34, %v142_v33 }
  0x3e   :  { %597 = vmatpush1.bf16.msra.mxu1 %v596_v8  ;;  %v84_v40 = vld [vmem:[#allocation5 + $0x138] sm:$0xff]  ;;  %v141_v42 = vld [vmem:[#allocation5 + $0x300] sm:$0xff]  ;;  %v143_v43 = vld [vmem:[#allocation5 + $0x310] sm:$0xff]  ;;  %v608_v44 = vpack.c.bf16 %v79_v37, %v77_v36 }
  0x3f   :  { %599 = vmatprep.subr.bf16.mxu1 %v598_v11  ;;  %v146_v45 = vld [vmem:[#allocation5 + $0x328] sm:$0xff]  ;;  %v148_v46 = vld [vmem:[#allocation5 + $0x338] sm:$0xff]  ;;  %v610_v47 = vpack.c.bf16 %v84_v40, %v82_v39  ;;  %v81_v48 = vld [vmem:[#allocation5 + $0x120] sm:$0xff]  ;;  %v672_v50 = vpack.c.bf16 %v143_v43, %v141_v42 }
  0x40   :  { %661 = vmatpush1.bf16.msra.mxu0 %v660_v14  ;;  %v83_v49 = vld [vmem:[#allocation5 + $0x130] sm:$0xff]  ;;  %v86_v51 = vld [vmem:[#allocation5 + $0x148] sm:$0xff]  ;;  %v88_v52 = vld [vmem:[#allocation5 + $0x158] sm:$0xff]  ;;  %v674_v53 = vpack.c.bf16 %v148_v46, %v146_v45 }
  0x41   :  { %663 = vmatprep.subr.bf16.mxu0 %v662_v17  ;;  %v145_v54 = vld [vmem:[#allocation5 + $0x320] sm:$0xff]  ;;  %v147_v55 = vld [vmem:[#allocation5 + $0x330] sm:$0xff]  ;;  %v612_v56 = vpack.c.bf16 %v83_v49, %v81_v48  ;;  %v150_v57 = vld [vmem:[#allocation5 + $0x348] sm:$0xff]  ;;  %v614_v59 = vpack.c.bf16 %v88_v52, %v86_v51 }
  0x42   :  { %601 = vmatpush1.bf16.msra.mxu1 %v600_v20  ;;  %v152_v58 = vld [vmem:[#allocation5 + $0x358] sm:$0xff]  ;;  %v85_v60 = vld [vmem:[#allocation5 + $0x140] sm:$0xff]  ;;  %v87_v61 = vld [vmem:[#allocation5 + $0x150] sm:$0xff]  ;;  %v676_v62 = vpack.c.bf16 %v147_v55, %v145_v54 }
  0x43   :  { %603 = vmatprep.subr.bf16.mxu1 %v602_v23  ;;  %v90_v63 = vld [vmem:[#allocation5 + $0x168] sm:$0xff]  ;;  %v92_v0 = vld [vmem:[#allocation5 + $0x178] sm:$0xff]  ;;  %v678_v1 = vpack.c.bf16 %v152_v58, %v150_v57  ;;  %v149_v2 = vld [vmem:[#allocation5 + $0x340] sm:$0xff]  ;;  %v616_v4 = vpack.c.bf16 %v87_v61, %v85_v60 }
  0x44   :  { %665 = vmatpush1.bf16.msra.mxu0 %v664_v26  ;;  %v151_v3 = vld [vmem:[#allocation5 + $0x350] sm:$0xff]  ;;  %v154_v5 = vld [vmem:[#allocation5 + $0x368] sm:$0xff]  ;;  %v156_v6 = vld [vmem:[#allocation5 + $0x378] sm:$0xff]  ;;  %v618_v7 = vpack.c.bf16 %v92_v0, %v90_v63  ;;  %v173_v0 = vlaneseq }
  0x45   :  { %667 = vmatprep.subr.bf16.mxu0 %v666_v29  ;;  %v89_v8 = vld [vmem:[#allocation5 + $0x160] sm:$0xff]  ;;  %v91_v9 = vld [vmem:[#allocation5 + $0x170] sm:$0xff]  ;;  %v42_v10 = vld [vmem:[#allocation2 + $0x8] sm:$0xff]  ;;  %v680_v11 = vpack.c.bf16 %v151_v3, %v149_v2  ;;  %v682_v15 = vpack.c.bf16 %v156_v6, %v154_v5 }
  0x46   :  { %605 = vmatpush1.bf16.msra.mxu1 %v604_v32  ;;  %v94_v12 = vld [vmem:[#allocation5 + $0x188] sm:$0xff]  ;;  %v96_v13 = vld [vmem:[#allocation5 + $0x198] sm:$0xff]  ;;  %258 = vmatprep.mubr.f32.mxu1 %v42_v10  ;;  %v153_v16 = vld [vmem:[#allocation5 + $0x360] sm:$0xff]  ;;  %v620_v18 = vpack.c.bf16 %v91_v9, %v89_v8 }
  0x47   :  { %607 = vmatprep.subr.bf16.mxu1 %v606_v35  ;;  %v44_v14 = vld [vmem:[#allocation2 + $0x18] sm:$0xff]  ;;  %v155_v17 = vld [vmem:[#allocation5 + $0x370] sm:$0xff]  ;;  %v158_v19 = vld [vmem:[#allocation5 + $0x388] sm:$0xff]  ;;  %v622_v21 = vpack.c.bf16 %v96_v13, %v94_v12 }
  0x48   :  { %669 = vmatpush1.bf16.msra.mxu0 %v668_v38  ;;  %565 = vmatprep.mubr.msk.f32.mxu0 %vm183_vm0, %v44_v14  ;;  %v160_v20 = vld [vmem:[#allocation5 + $0x398] sm:$0xff]  ;;  %v93_v22 = vld [vmem:[#allocation5 + $0x180] sm:$0xff]  ;;  %v95_v23 = vld [vmem:[#allocation5 + $0x190] sm:$0xff]  ;;  %v684_v24 = vpack.c.bf16 %v155_v17, %v153_v16 }
  0x49   :  { %671 = vmatprep.subr.bf16.mxu0 %v670_v41  ;;  %v98_v25 = vld [vmem:[#allocation5 + $0x1a8] sm:$0xff]  ;;  %v100_v26 = vld [vmem:[#allocation5 + $0x1b8] sm:$0xff]  ;;  %v686_v27 = vpack.c.bf16 %v160_v20, %v158_v19  ;;  %v157_v28 = vld [vmem:[#allocation5 + $0x380] sm:$0xff]  ;;  %v624_v30 = vpack.c.bf16 %v95_v23, %v93_v22 }
  0x4a   :  { %609 = vmatpush1.bf16.msra.mxu1 %v608_v44  ;;  %v159_v29 = vld [vmem:[#allocation5 + $0x390] sm:$0xff]  ;;  %v162_v31 = vld [vmem:[#allocation5 + $0x3a8] sm:$0xff]  ;;  %v164_v32 = vld [vmem:[#allocation5 + $0x3b8] sm:$0xff]  ;;  %v626_v33 = vpack.c.bf16 %v100_v26, %v98_v25 }
  0x4b   :  { %611 = vmatprep.subr.bf16.mxu1 %v610_v47  ;;  %v97_v34 = vld [vmem:[#allocation5 + $0x1a0] sm:$0xff]  ;;  %v99_v35 = vld [vmem:[#allocation5 + $0x1b0] sm:$0xff]  ;;  %v688_v36 = vpack.c.bf16 %v159_v29, %v157_v28  ;;  %v102_v37 = vld [vmem:[#allocation5 + $0x1c8] sm:$0xff]  ;;  %v690_v39 = vpack.c.bf16 %v164_v32, %v162_v31 }
  0x4c   :  { %673 = vmatpush1.bf16.msra.mxu0 %v672_v50  ;;  %v104_v38 = vld [vmem:[#allocation5 + $0x1d8] sm:$0xff]  ;;  %v161_v40 = vld [vmem:[#allocation5 + $0x3a0] sm:$0xff]  ;;  %v163_v41 = vld [vmem:[#allocation5 + $0x3b0] sm:$0xff]  ;;  %v628_v42 = vpack.c.bf16 %v99_v35, %v97_v34  ;;  %v805_v35 = vmov 683565275  }
  0x4d   :  { %675 = vmatprep.subr.bf16.mxu0 %v674_v53  ;;  %v166_v43 = vld [vmem:[#allocation5 + $0x3c8] sm:$0xff]  ;;  %v168_v44 = vld [vmem:[#allocation5 + $0x3d8] sm:$0xff]  ;;  %v630_v45 = vpack.c.bf16 %v104_v38, %v102_v37  ;;  %v101_v46 = vld [vmem:[#allocation5 + $0x1c0] sm:$0xff]  ;;  %v692_v48 = vpack.c.bf16 %v163_v41, %v161_v40  ;;  %v807_v41 = vmov 2131351028  }
  0x4e   :  { %613 = vmatpush1.bf16.msra.mxu1 %v612_v56  ;;  %v103_v47 = vld [vmem:[#allocation5 + $0x1d0] sm:$0xff]  ;;  %v106_v49 = vld [vmem:[#allocation5 + $0x1e8] sm:$0xff]  ;;  %v108_v50 = vld [vmem:[#allocation5 + $0x1f8] sm:$0xff]  ;;  %v694_v51 = vpack.c.bf16 %v168_v44, %v166_v43  ;;  %v808_v43 = vmov 2102212464  }
  0x4f   :  { %615 = vmatprep.subr.bf16.mxu1 %v614_v59  ;;  %v165_v52 = vld [vmem:[#allocation5 + $0x3c0] sm:$0xff]  ;;  %v167_v53 = vld [vmem:[#allocation5 + $0x3d0] sm:$0xff]  ;;  %v632_v54 = vpack.c.bf16 %v103_v47, %v101_v46  ;;  %v634_v55 = vpack.c.bf16 %v108_v50, %v106_v49  ;;  %v170_v60 = vld [vmem:[#allocation5 + $0x3e8] sm:$0xf] }
  0x50   :  { %677 = vmatpush1.bf16.msra.mxu0 %v676_v62  ;;  %v105_v56 = vld [vmem:[#allocation5 + $0x1e0] sm:$0xff]  ;;  %v107_v57 = vld [vmem:[#allocation5 + $0x1f0] sm:$0xff]  ;;  %v696_v58 = vpack.c.bf16 %v167_v53, %v165_v52  ;;  %v810_v52 = vmov 1326507024  }
  0x51   :  { %679 = vmatprep.subr.bf16.mxu0 %v678_v1  ;;  %v636_v59 = vpack.c.bf16 %v107_v57, %v105_v56  ;;  %v169_v61 = vld [vmem:[#allocation5 + $0x3e0] sm:$0xf]  ;;  %v43_v63 = vld [vmem:[#allocation2 + $0x10] sm:$0xff]  ;;  %v174_v1 = vshrl.u32 %v173_v0, 7 }
  0x52   :  { %617 = vmatpush1.bf16.msra.mxu1 %v616_v4  ;;  %v41_v62 = vld [vmem:[#allocation2] sm:$0xff] }
  0x53   :  { %619 = vmatprep.subr.bf16.mxu1 %v618_v7  ;;  %v175_v2 = vsub.s32 0, %v174_v1  ;;  %v171_v3 = vld [vmem:[%s943_s2] sm:$0x3]  ;;  %v179_v4 = vsub.s32 1, %v174_v1  ;;  %s811_s2 = smov [#allocation7]  }
  0x54   :  { %681 = vmatpush1.bf16.msra.mxu0 %v680_v11  ;;  %s553_s11 = sshll.u32 %s811_s2, 4  ;;  %s554_s11 = int_to_ptr.vmem [resolvable:$true] %s553_s11 }
  0x55   :  { %683 = vmatprep.subr.bf16.mxu0 %v682_v15  ;;  %v176_v5 = vrot.slane %v171_v3, %v175_v2  ;;  %v180_v6 = vrot.slane %v171_v3, %v179_v4  ;;  %s773_s12 = scalar_lea.vmem %s554_s11, 256  ;;  %p778_p3 = scmp.lt.s32.totalorder %s554_s11, %s554_s11 }
  0x56   :  { %621 = vmatpush1.bf16.msra.mxu1 %v620_v18  ;;  %p774_p2 = scmp.ne.s32.totalorder %s554_s11, %s773_s12  ;;  %p779_p4 = scmp.lt.s32.totalorder %s773_s12, %s773_s12 }
  0x57   :  { %623 = vmatprep.subr.bf16.mxu1 %v622_v21 }
  0x58   :  { %685 = vmatpush1.bf16.msra.mxu0 %v684_v24  ;;  %p780_p5 = por %p779_p4, %p778_p3 }
  0x59   :  { %687 = vmatprep.subr.bf16.mxu0 %v686_v27 }
  0x5a   :  { %625 = vmatpush1.bf16.msra.mxu1 %v624_v30  ;;  %p781_p6 = pnand %p780_p5, %p774_p2 }
  0x5b   :  { %627 = vmatprep.subr.bf16.mxu1 %v626_v33 }
  0x5c   :  { %689 = vmatpush1.bf16.msra.mxu0 %v688_v36 }
  0x5d   :  { %691 = vmatprep.subr.bf16.mxu0 %v690_v39  ;;  %v806_v39 = vmov 2475754826  }
  0x5e   :  { %629 = vmatpush1.bf16.msra.mxu1 %v628_v42 }
  0x5f   :  { %631 = vmatprep.subr.bf16.mxu1 %v630_v45  ;;  %v809_v45 = vmov 920167782  }
  0x60   :  { %693 = vmatpush1.bf16.msra.mxu0 %v692_v48 }
  0x61   :  { %695 = vmatprep.subr.bf16.mxu0 %v694_v51 }
  0x62   :  { %633 = vmatpush1.bf16.msra.mxu1 %v632_v54 }
  0x63   :  { %635 = vmatprep.subr.bf16.mxu1 %v634_v55 }
  0x64   :  { %697 = vmatpush1.bf16.msra.mxu0 %v696_v58 }
  0x65   :  { %563 = vmatprep.subr.msk.mxu0 %vm187_vm1, %v170_v60 }
  0x66   :  { %637 = vmatpush1.bf16.msra.mxu1 %v636_v59 }
  0x68   :  { %564 = vmatpush1.msk.msra.mxu0 %vm187_vm1, %v169_v61 }
  0x69   :  { %259 = vmatmul.mubr.f32.vlgmr.msra.gmra.mrb[0].mxu1 %v41_v62  ;;  %330 = vmatmul.mubr.f32.vlgmr.msra.gmra.mrb[0].mxu0 %v43_v63 }
 0x13c   :  { %v260_v7 = vpop.f32.mrb[0].mxu1  ;;  %v331_v8 = vpop.f32.mrb[0].mxu0 }
 0x13d   :  { %v261_v9 = vadd.f32 %v260_v7, %v176_v5  ;;  %v262_v10 = vpop.f32.mrb[1].mxu1  ;;  %v333_v11 = vpop.f32.mrb[1].mxu0 }
 0x13e   :  { %v263_v12 = vadd.f32 %v262_v10, %v180_v6 }
 0x13f   :  { %v867_v13 = vadd.f32 %v331_v8, %v261_v9 }
 0x140   :  { %v869_v14 = vadd.f32 %v333_v11, %v263_v12 }
 0x141   :  { %v336_v15 = vand.u32 2147483647, %v867_v13  ;;  %v339_v16 = vand.u32 2139095040, %v867_v13  ;;  %vm338_vm0 = vcmp.lt.s32.totalorder %v867_v13, 0 }
 0x142   :  { %v443_v17 = vand.u32 2139095040, %v869_v14  ;;  %v440_v20 = vand.u32 2147483647, %v869_v14 }
 0x143   :  { %v340_v18 = vshrl.u32 %v339_v16, 23  ;;  %v343_v19 = vand.u32 8388607, %v336_v15  ;;  %vm337_vm1 = vcmp.le.f32.partialorder %v336_v15, 0.7853982 }
 0x144   :  { %v444_v21 = vshrl.u32 %v443_v17, 23  ;;  %v879_v26 = vand.u32 8388607, %v440_v20 }
 0x145   :  { %v566_v22 = vadd.s32 4294967169, %v340_v18  ;;  %v344_v25 = vor.u32 8388608, %v343_v19 }
 0x146   :  { %v570_v23 = vadd.s32 4294967169, %v444_v21  ;;  %v448_v33 = vor.u32 8388608, %v879_v26 }
 0x147   :  { %v346_v24 = vadd.s32 1, %v566_v22  ;;  %v881_v32 = vshll.u32 %v344_v25, 8 }
 0x148   :  { %v450_v27 = vadd.s32 1, %v570_v23 }
 0x149   :  { %vm347_vm2 = vcmp.gt.s32.totalorder %v346_v24, 0 }
 0x14a   :  { %v348_v28 = vsel %vm347_vm2, %v346_v24, 0  ;;  %vm451_vm3 = vcmp.gt.s32.totalorder %v450_v27, 0  ;;  %vm442_vm2 = vcmp.lt.s32.totalorder %v869_v14, 0 }
 0x14b   :  { %v349_v29 = vshrl.u32 %v348_v28, 5  ;;  %v350_v30 = vand.u32 31, %v348_v28  ;;  %v452_v31 = vsel %vm451_vm3, %v450_v27, 0  ;;  %v488_v27 = vshll.u32 %v448_v33, 8 }
 0x14c   :  { %v884_v37 = vshrl.u32 %v452_v31, 5  ;;  %v454_v38 = vand.u32 31, %v452_v31  ;;  %vm441_vm3 = vcmp.le.f32.partialorder %v440_v20, 0.7853982 }
 0x14d   :  { %v351_v34 = vsub.s32 32, %v350_v30  ;;  %v353_v36 = vshll.u32 %v805_v35, %v350_v30  ;;  %v356_v40 = vshll.u32 %v806_v39, %v350_v30  ;;  %v359_v42 = vshll.u32 %v807_v41, %v350_v30 }
 0x14e   :  { %v362_v44 = vshll.u32 %v808_v43, %v350_v30  ;;  %v365_v46 = vshll.u32 %v809_v45, %v350_v30  ;;  %vm368_vm4 = vcmp.lt.s32.totalorder %v349_v29, 1  ;;  %vm369_vm5 = vcmp.lt.s32.totalorder %v349_v29, 2 }
 0x14f   :  { %v354_v47 = vshrl.u32 %v806_v39, %v351_v34  ;;  %v357_v48 = vshrl.u32 %v807_v41, %v351_v34  ;;  %v360_v49 = vshrl.u32 %v808_v43, %v351_v34  ;;  %v352_v50 = vshrl.u32 %v805_v35, %v351_v34 }
 0x150   :  { %v363_v51 = vshrl.u32 %v809_v45, %v351_v34  ;;  %v366_v53 = vshrl.u32 %v810_v52, %v351_v34  ;;  %v455_v57 = vsub.s32 32, %v454_v38  ;;  %vm370_vm6 = vcmp.lt.s32.totalorder %v349_v29, 3 }
 0x151   :  { %v355_v54 = vor.u32 %v354_v47, %v353_v36  ;;  %v358_v55 = vor.u32 %v357_v48, %v356_v40  ;;  %v361_v56 = vor.u32 %v360_v49, %v359_v42  ;;  %vm371_vm7 = vcmp.lt.s32.totalorder %v349_v29, 4 }
 0x152   :  { %v364_v58 = vor.u32 %v363_v51, %v362_v44  ;;  %v367_v59 = vor.u32 %v366_v53, %v365_v46  ;;  %v457_v3 = vshll.u32 %v805_v35, %v454_v38  ;;  %v458_v6 = vshrl.u32 %v806_v39, %v455_v57 }
 0x153   :  { %v372_v60 = vsel %vm368_vm4, %v352_v50, %v355_v54  ;;  %v373_v61 = vsel %vm371_vm7, %v361_v56, 2102212464  ;;  %v376_v62 = vsel %vm368_vm4, %v355_v54, %v358_v55  ;;  %v380_v63 = vsel %vm368_vm4, %v358_v55, %v361_v56 }
 0x154   :  { %v374_v0 = vsel %vm370_vm6, %v358_v55, %v373_v61  ;;  %v377_v1 = vsel %vm371_vm7, %v364_v58, 920167782  ;;  %v381_v2 = vsel %vm371_vm7, %v367_v59, 1326507024  ;;  %v460_v7 = vshll.u32 %v806_v39, %v454_v38 }
 0x155   :  { %v378_v4 = vsel %vm370_vm6, %v361_v56, %v377_v1  ;;  %v382_v5 = vsel %vm370_vm6, %v364_v58, %v381_v2  ;;  %v375_v8 = vsel %vm369_vm5, %v372_v60, %v374_v0  ;;  %v461_v11 = vshrl.u32 %v807_v41, %v455_v57 }
 0x156   :  { %v379_v9 = vsel %vm369_vm5, %v376_v62, %v378_v4  ;;  %v383_v10 = vsel %vm369_vm5, %v380_v63, %v382_v5  ;;  %v459_v19 = vor.u32 %v458_v6, %v457_v3  ;;  %v463_v22 = vshll.u32 %v807_v41, %v454_v38 }
 0x157   :  { %v893_v12 = vmul.u32.u64.low %v881_v32, %v383_v10  ;;  %v894_v16 = vmul.u32.u64.high %v881_v32, %v383_v10, %v893_v12  ;;  %v897_v17 = vmul.u32.u64.low %v881_v32, %v379_v9  ;;  %v898_v18 = vmul.u32.u64.high %v881_v32, %v379_v9, %v897_v17 }
 0x158   :  { %v462_v21 = vor.u32 %v461_v11, %v460_v7  ;;  %v464_v23 = vshrl.u32 %v808_v43, %v455_v57  ;;  %v466_v24 = vshll.u32 %v808_v43, %v454_v38  ;;  %v467_v25 = vshrl.u32 %v809_v45, %v455_v57 }
 0x159   :  { %v470_v26 = vshrl.u32 %v810_v52, %v455_v57  ;;  %v391_v28 = vmul.u32 %v881_v32, %v375_v8  ;;  %v456_v29 = vshrl.u32 %v805_v35, %v455_v57  ;;  %v469_v31 = vshll.u32 %v809_v45, %v454_v38 }
 0x15a   :  { %v465_v30 = vor.u32 %v464_v23, %v463_v22  ;;  %vm393_vm8 = vc.u32 %v894_v16, %v897_v17  ;;  %v394_v34 = vadd.s32 1, %v898_v18  ;;  %v468_v36 = vor.u32 %v467_v25, %v466_v24 }
 0x15b   :  { %vm472_vm9 = vcmp.lt.s32.totalorder %v884_v37, 1  ;;  %v471_v39 = vor.u32 %v470_v26, %v469_v31  ;;  %vm474_vm10 = vcmp.lt.s32.totalorder %v884_v37, 3  ;;  %vm475_vm11 = vcmp.lt.s32.totalorder %v884_v37, 4 }
 0x15c   :  { %v480_v40 = vsel %vm472_vm9, %v459_v19, %v462_v21  ;;  %v395_v33 = vsel %vm393_vm8, %v394_v34, %v898_v18  ;;  %v477_v41 = vsel %vm475_vm11, %v465_v30, 2102212464  ;;  %v481_v32 = vsel %vm475_vm11, %v468_v36, 920167782 }
 0x15d   :  { %v484_v35 = vsel %vm472_vm9, %v462_v21, %v465_v30  ;;  %v396_v42 = vadd.s32 %v395_v33, %v391_v28  ;;  %vm473_vm12 = vcmp.lt.s32.totalorder %v884_v37, 2  ;;  %v482_v38 = vsel %vm474_vm10, %v465_v30, %v481_v32 }
 0x15e   :  { %v485_v43 = vsel %vm475_vm11, %v471_v39, 1326507024  ;;  %v476_v44 = vsel %vm472_vm9, %v456_v29, %v459_v19  ;;  %v478_v45 = vsel %vm474_vm10, %v462_v21, %v477_v41  ;;  %v483_v46 = vsel %vm473_vm12, %v480_v40, %v482_v38 }
 0x15f   :  { %v486_v47 = vsel %vm474_vm10, %v468_v36, %v485_v43  ;;  %v397_v48 = vadd.s32 536870912, %v396_v42  ;;  %v908_v50 = vmul.u32.u64.low %v488_v27, %v483_v46  ;;  %v909_v51 = vmul.u32.u64.high %v488_v27, %v483_v46, %v908_v50 }
 0x160   :  { %v487_v49 = vsel %vm473_vm12, %v484_v35, %v486_v47  ;;  %v479_v55 = vsel %vm473_vm12, %v476_v44, %v478_v45  ;;  %v392_v7 = vadd.s32 %v897_v17, %v894_v16  ;;  %vm428_vm7 = vweird.f32 %v867_v13 }
 0x161   :  { %v911_v52 = vmul.u32.u64.low %v488_v27, %v487_v49  ;;  %v912_v53 = vmul.u32.u64.high %v488_v27, %v487_v49, %v911_v52  ;;  %v398_v54 = vshrl.u32 %v397_v48, 30  ;;  %v498_v57 = vadd.s32 1, %v909_v51 }
 0x162   :  { %v495_v37 = vmul.u32 %v488_v27, %v479_v55  ;;  %vm545_vm11 = vcmask 998400   ;;  %vm532_vm12 = vweird.f32 %v869_v14 }
 0x163   :  { %v399_v56 = vshll.u32 %v398_v54, 30  ;;  %vm497_vm13 = vc.u32 %v912_v53, %v908_v50  ;;  %v496_v28 = vadd.s32 %v908_v50, %v912_v53  ;;  %v422_v17 = vsub.s32 4, %v398_v54 }
 0x164   :  { %v499_v59 = vsel %vm497_vm13, %v498_v57, %v909_v51 }
 0x165   :  { %v400_v58 = vsub.s32 %v396_v42, %v399_v56  ;;  %v500_v60 = vadd.s32 %v499_v59, %v495_v37  ;;  %v423_v32 = vsel %vm338_vm0, %v422_v17, %v398_v54 }
 0x166   :  { %v425_v44 = vsel %vm337_vm1, 0, %v423_v32 }
 0x167   :  { %v402_v61 = vsub.s32 0, %v400_v58  ;;  %v501_v62 = vadd.s32 536870912, %v500_v60  ;;  %v429_v47 = vadd.s32 3, %v425_v44 }
 0x169   :  { %v567_v63 = vmin.u32 %v402_v61, %v400_v58  ;;  %v502_v0 = vshrl.u32 %v501_v62, 30  ;;  %v430_v51 = vand.u32 3, %v429_v47 }
 0x16b   :  { %v404_v1 = vclz %v567_v63  ;;  %v503_v2 = vshll.u32 %v502_v0, 30  ;;  %v526_v46 = vsub.s32 4, %v502_v0  ;;  %vm435_vm4 = vcmp.eq.s32.totalorder %v430_v51, 2 }
 0x16c   :  { %vm432_vm5 = vcmp.eq.s32.totalorder %v430_v51, 0  ;;  %vm431_vm6 = vcmp.lt.s32.totalorder %v430_v51, 2 }
 0x16d   :  { %v568_v3 = vadd.s32 4294967294, %v404_v1  ;;  %v504_v4 = vsub.s32 %v500_v60, %v503_v2  ;;  %v527_v49 = vsel %vm442_vm2, %v526_v46, %v502_v0 }
 0x16e   :  { %v529_v53 = vsel %vm441_vm3, 0, %v527_v49 }
 0x16f   :  { %vm569_vm14 = vcmp.lt.s32.totalorder %v568_v3, 0  ;;  %v506_v6 = vsub.s32 0, %v504_v4  ;;  %v533_v37 = vadd.s32 3, %v529_v53 }
 0x170   :  { %v407_v5 = vsel %vm569_vm14, 0, %v568_v3 }
 0x171   :  { %v408_v8 = vsub.s32 32, %v407_v5  ;;  %v412_v9 = vsub.s32 4294967266, %v407_v5  ;;  %v571_v10 = vmin.u32 %v506_v6, %v504_v4  ;;  %v409_v11 = vshll.u32 %v400_v58, %v407_v5 }
 0x172   :  { %v534_v60 = vand.u32 3, %v533_v37 }
 0x173   :  { %v410_v12 = vshrl.u32 %v392_v7, %v408_v8  ;;  %v413_v18 = vadd.s32 127, %v412_v9  ;;  %v508_v19 = vclz %v571_v10 }
 0x174   :  { %vm539_vm8 = vcmp.eq.s32.totalorder %v534_v60, 2  ;;  %vm536_vm9 = vcmp.eq.s32.totalorder %v534_v60, 0  ;;  %vm535_vm10 = vcmp.lt.s32.totalorder %v534_v60, 2 }
 0x175   :  { %v411_v21 = vor.u32 %v410_v12, %v409_v11  ;;  %v414_v22 = vshll.u32 %v413_v18, 23  ;;  %v572_v23 = vadd.s32 4294967294, %v508_v19 }
 0x177   :  { %v415_v24 = vor.u32 4788187, %v414_v22  ;;  %vm573_vm15 = vcmp.lt.s32.totalorder %v572_v23, 0  ;;  %v418_v26 = vcvt.s32.f32 %v411_v21 }
 0x178   :  { %v511_v27 = vsel %vm573_vm15, 0, %v572_v23 }
 0x179   :  { %v416_v25 = vand.u32 2147483647, %v415_v24  ;;  %v512_v29 = vsub.s32 32, %v511_v27  ;;  %v516_v30 = vsub.s32 4294967266, %v511_v27  ;;  %v513_v31 = vshll.u32 %v504_v4, %v511_v27 }
 0x17b   :  { %v419_v16 = vmul.f32 %v418_v26, %v416_v25  ;;  %v514_v34 = vshrl.u32 %v496_v28, %v512_v29  ;;  %v517_v36 = vadd.s32 127, %v516_v30 }
 0x17d   :  { %v420_v39 = vxor.u32 2147483648, %v419_v16  ;;  %v515_v40 = vor.u32 %v514_v34, %v513_v31  ;;  %v518_v33 = vshll.u32 %v517_v36, 23 }
 0x17f   :  { %v421_v41 = vsel %vm338_vm0, %v420_v39, %v419_v16  ;;  %v519_v42 = vor.u32 4788187, %v518_v33  ;;  %v522_v43 = vcvt.s32.f32 %v515_v40 }
 0x180   :  { %v424_v35 = vsel %vm337_vm1, %v867_v13, %v421_v41 }
 0x181   :  { %721 = vcosq.f32 %v424_v35  ;;  %v520_v38 = vand.u32 2147483647, %v519_v42 }
 0x182   :  { %723 = vsinq.f32 %v424_v35 }
 0x183   :  { %v523_v45 = vmul.f32 %v522_v43, %v520_v38 }
 0x185   :  { %v524_v48 = vxor.u32 2147483648, %v523_v45 }
 0x187   :  { %v525_v15 = vsel %vm442_vm2, %v524_v48, %v523_v45 }
 0x188   :  { %v528_v50 = vsel %vm441_vm3, %v869_v14, %v525_v15 }
 0x189   :  { %725 = vcosq.f32 %v528_v50 }
 0x18a   :  { %727 = vsinq.f32 %v528_v50 }
 0x18b   :  { %v722_v52 = vpop.eup %721 }
 0x18c   :  { %v724_v54 = vpop.eup %723  ;;  %v436_v55 = vxor.u32 2147483648, %v722_v52 }
 0x18d   :  { %v433_v56 = vxor.u32 2147483648, %v724_v54 }
 0x18e   :  { %v437_v57 = vsel %vm435_vm4, %v436_v55, %v724_v54 }
 0x18f   :  { %v434_v58 = vsel %vm432_vm5, %v722_v52, %v433_v56 }
 0x190   :  { %v438_v20 = vsel %vm431_vm6, %v434_v58, %v437_v57 }
 0x191   :  { %v439_v59 = vsel %vm428_vm7, nan, %v438_v20 }
 0x192   :  { %544 = vst [vmem:[#allocation7] sm:$0xff] %v439_v59 }
 0x193   :  { %v726_v61 = vpop.eup %725 }
 0x194   :  { %v728_v62 = vpop.eup %727  ;;  %v540_v63 = vxor.u32 2147483648, %v726_v61 }
 0x195   :  { %v537_v0 = vxor.u32 2147483648, %v728_v62 }
 0x196   :  { %v541_v1 = vsel %vm539_vm8, %v540_v63, %v728_v62 }
 0x197   :  { %v538_v2 = vsel %vm536_vm9, %v726_v61, %v537_v0 }
 0x198   :  { %v542_v3 = vsel %vm535_vm10, %v538_v2, %v541_v1 }
 0x199   :  { %v543_v13 = vsel %vm532_vm12, nan, %v542_v3 }
 0x19a   :  { %546 = vst.msk [vmem:[#allocation7 + $0x8] sm:$0xff] %vm545_vm11, %v543_v13 }
 0x19b   :  { %784 = shalt.err (!%p781_p6)
}
 0x19c   :  { %s785_s15 = scalar_lea.hbm %s944_s3, 256 }
 0x19d   :  { %p786_p7 = scmp.ne.s32.totalorder %s944_s3, %s785_s15  ;;  %p789_p8 = scmp.lt.u32.totalorder %s785_s15, %s944_s3 }
 0x19f   :  { %p791_p9 = pnand %p789_p8, %p786_p7 }
 0x1a1   :  { %794 = shalt.err (!%p791_p9)
}
 0x1a2   :  { %556 = dma.vmem_to_hbm [thread:$0]  %s554_s11, 256, %s944_s3, [#allocation4]  }
 0x1a3   :  { %799 = dma.done.wait [#allocation4], 256  }
 0x1a4   :  { %800 = vsyncadd [#allocation4], 4294967040 }
 0x1a5   :  { %560 = vsyncpa [#allocation3], 1 }
 0x1a6   :  { %561 = vsyncpa [#allocation6], 1 }
 0x1a7   :  { %562 = vsyncpa [#allocation4], 1 }

</bundles_post_ra>
